<compile_context>
chip_gen: v7x
topology: tpu7x:2x2x1
jax: 0.10.0
libtpu: 0.0.40
codegen_flags: <defaults>
</compile_context>

<pallas_src>
import functools

import jax
import jax.numpy as jnp
import numpy as np
from jax.experimental import pallas as pl
from jax.experimental.pallas import tpu as pltpu


# ----------------------------------------------------------------------------
# Kernel: one grid step == one graph
# ----------------------------------------------------------------------------
def _gcn_graph_kernel(x_ref, ea_ref, src_ref, dst_ref,
                      nn1_w_ref, t1_ref, r1_ref, root1_w_ref, root1_b_ref,
                      nn2_w_ref, t2_ref, r2_ref, root2_w_ref, root2_b_ref,
                      sig_wh_ref, sig_wx_ref, sig_b_ref,
                      tanh_wh_ref, tanh_wx_ref, tanh_b_ref,
                      f1_w_ref, f1_b_ref, f2_w_ref, f2_b_ref,
                      out_ref, *, relu_coef, out_divide):
    f32 = jnp.float32
    bf16 = jnp.bfloat16

    x0 = x_ref[...]                      # [Ng, Din]   this graph's node feats
    ea = ea_ref[...]                     # [Eg, De+1]  edge feats + ones col
    n_g = x0.shape[0]
    e_g = ea.shape[0]

    src = src_ref[...]                   # [Eg, 1] int32, graph-local ids
    dst = dst_ref[0]                     # [1, Eg] int32, graph-local ids

    # One-hot connectivity built on-chip; 0/1 is exact in bf16, so the
    # gather/scatter dots run as bf16 MXU matmuls with f32 accumulation.
    gsrc = (jax.lax.broadcasted_iota(jnp.int32, (e_g, n_g), 1) == src
            ).astype(f32).astype(bf16)   # [Eg, Ng]  one-hot(src)
    sdst = (jax.lax.broadcasted_iota(jnp.int32, (n_g, e_g), 0) == dst
            ).astype(f32).astype(bf16)   # [Ng, Eg]  one-hot(dst)^T

    def leaky(v):
        return jnp.maximum(v, relu_coef * v)      # valid: 0 < relu_coef < 1

    def nnconv(h, nn_w_ref_l, t_ref_l, r_ref_l, root_w_ref_l, root_b_ref_l):
        # PyG NNConv (aggr='add'):
        #   out[i] = root_b + h[i] @ root_w + sum_{e: dst(e)=i} h[src(e)] @ W_e
        #   W_e    = reshape(nn(eattr[e]), [Din, H])
        # One MXU matmul per stage (no De-loop of tiny matmuls):
        #   W_e   = [eattr,1] @ [nn_w;nn_b]  -> [Eg, Din*H]  (bias folded)
        #   h_rep = h_src @ T                -> [Eg, Din*H]  (0/1 expansion)
        #   msg   = (W_e * h_rep) @ R        -> [Eg, H]      (K = Din*H)
        h_src = jnp.dot(gsrc, h.astype(bf16), preferred_element_type=f32)
        w_e = jnp.dot(ea, nn_w_ref_l[...], preferred_element_type=f32)
        h_rep = jnp.dot(h_src, t_ref_l[...], preferred_element_type=f32)
        msg = jnp.dot(w_e * h_rep, r_ref_l[...], preferred_element_type=f32)
        agg = jnp.dot(sdst, msg.astype(bf16), preferred_element_type=f32)
        out = (agg
               + jnp.dot(h, root_w_ref_l[...], preferred_element_type=f32)
               + root_b_ref_l[...])
        return leaky(out)

    h1 = nnconv(x0, nn1_w_ref, t1_ref, r1_ref, root1_w_ref, root1_b_ref)
    h2 = nnconv(h1, nn2_w_ref, t2_ref, r2_ref, root2_w_ref, root2_b_ref)

    # torch.cat([h2, x0], 1) @ W  ==  h2 @ W_h + x0 @ W_x  (concat folded).
    # sig/tanh kept as separate projections on purpose: fusing into one
    # 2L-wide matmul would require a sub-128 lane split of the result.
    sx = (jnp.dot(h2, sig_wh_ref[...], preferred_element_type=f32)
          + jnp.dot(x0, sig_wx_ref[...], preferred_element_type=f32)
          + sig_b_ref[...])
    sx = jnp.clip(sx, -30.0, 30.0)       # matches torch.clip in the forward
    tx = (jnp.dot(h2, tanh_wh_ref[...], preferred_element_type=f32)
          + jnp.dot(x0, tanh_wx_ref[...], preferred_element_type=f32)
          + tanh_b_ref[...])
    # The PyTorch forward literally computes 1/(1 + exp(+sx)) (== sigmoid(-sx));
    # keep that sign.
    gated = pl.reciprocal(1.0 + jnp.exp(sx), approx=True) * jnp.tanh(tx)

    # global_add_pool restricted to this graph == plain node-axis sum.
    pooled = jnp.sum(gated, axis=0, keepdims=True)               # [1, L]

    y = leaky(jnp.dot(pooled, f1_w_ref[...], preferred_element_type=f32)
              + f1_b_ref[...])
    z = jnp.dot(y, f2_w_ref[...], preferred_element_type=f32) + f2_b_ref[...]
    out_ref[0] = pl.reciprocal(1.0 + jnp.exp(-z * (1.0 / out_divide)),
                               approx=True)


# ----------------------------------------------------------------------------
# Wrapper
# ----------------------------------------------------------------------------
def _resident(a):
    """Full-array block, constant index map (fetched once, stays resident)."""
    nd = a.ndim
    return pl.BlockSpec(a.shape, lambda g: (0,) * nd)


def gcn_edge_reward_forward(x, edge_attr, src, dst, batch, params,
                            *, num_graphs, relu_coef=0.05, out_divide=4.0):
    """Forward (add_conv_link path) as one graph-gridded Pallas kernel.

    Assumes the standard contiguous PyG batch layout with the SAME number of
    nodes and edges per graph (as produced by the harness below); the `batch`
    vector is implied by that layout and is not read on-device.
    """
    n, in_dim = x.shape
    e, edge_dim = edge_attr.shape
    hidden_dim = params['root1_w'].shape[1]
    lin_hidden = params['sig_wh'].shape[1]
    out_hidden = params['f1_w'].shape[1]
    del batch  # implied by the uniform contiguous layout (see docstring)

    assert n % num_graphs == 0 and e % num_graphs == 0, "uniform graphs required"
    n_g, e_g = n // num_graphs, e // num_graphs
    # TODO(synk): ragged batches (unequal nodes/edges per graph) need
    # scalar-prefetched per-graph offsets (PrefetchScalarGridSpec) in the
    # index_maps plus in-kernel edge masking.
    # TODO(synk): for a single very large graph, additionally sub-tile the
    # edge axis (VMEM accumulator + pl.when init/finalize) so the per-tile
    # (Eg_t, Ng) one-hots stay well under v7x's 64 MiB VMEM.

    # ---- host-side packing (tiny, once per call) ---------------------------
    ones_col = jnp.ones((e, 1), jnp.float32)
    ea_aug = jnp.concatenate([edge_attr.astype(jnp.float32), ones_col], axis=1)
    src_local = jnp.mod(src.astype(jnp.int32), n_g).reshape(e, 1)
    dst_local = jnp.mod(dst.astype(jnp.int32), n_g).reshape(num_graphs, 1, e_g)

    def expand_reduce(din):
        t = np.repeat(np.eye(din, dtype=np.float32), hidden_dim, axis=1)
        r = np.tile(np.eye(hidden_dim, dtype=np.float32), (din, 1))
        return jnp.asarray(t), jnp.asarray(r)

    t1, r1 = expand_reduce(in_dim)           # [Din, Din*H], [Din*H, H]
    t2, r2 = expand_reduce(hidden_dim)       # [H,   H*H],   [H*H,   H]
    nn1_w_aug = jnp.concatenate([params['nn1_w'], params['nn1_b']], axis=0)
    nn2_w_aug = jnp.concatenate([params['nn2_w'], params['nn2_b']], axis=0)

    weights = (nn1_w_aug, t1, r1, params['root1_w'], params['root1_b'],
               nn2_w_aug, t2, r2, params['root2_w'], params['root2_b'],
               params['sig_wh'], params['sig_wx'], params['sig_b'],
               params['tanh_wh'], params['tanh_wx'], params['tanh_b'],
               params['f1_w'], params['f1_b'], params['f2_w'], params['f2_b'])

    in_specs = ([pl.BlockSpec((n_g, in_dim), lambda g: (g, 0)),
                 pl.BlockSpec((e_g, edge_dim + 1), lambda g: (g, 0)),
                 pl.BlockSpec((e_g, 1), lambda g: (g, 0)),
                 pl.BlockSpec((1, 1, e_g), lambda g: (g, 0, 0))]
                + [_resident(w) for w in weights])

    # Advisory cost estimate for the whole call.
    k1, k2 = in_dim * hidden_dim, hidden_dim * hidden_dim
    flops = 2 * (e * n_g * (in_dim + hidden_dim)             # one-hot gathers
                 + e * (edge_dim + 1) * (k1 + k2)            # per-edge W_e
                 + e * (in_dim * k1 + hidden_dim * k2)       # h_rep expansion
                 + e * (k1 + k2) * hidden_dim                # msg contraction
                 + n * e_g * 2 * hidden_dim                  # scatter-adds
                 + n * (in_dim + hidden_dim) * hidden_dim    # root linears
                 + 2 * n * (hidden_dim + in_dim) * lin_hidden
                 + num_graphs * lin_hidden * out_hidden
                 + num_graphs * out_hidden)
    transcendentals = 3 * n * lin_hidden + 2 * num_graphs
    bytes_accessed = 4 * (x.size + ea_aug.size + 2 * e
                          + sum(int(w.size) for w in weights) + num_graphs)

    kern = functools.partial(_gcn_graph_kernel, relu_coef=relu_coef,
                             out_divide=out_divide)
    out = pl.pallas_call(
        kern,
        grid=(num_graphs,),
        out_shape=jax.ShapeDtypeStruct((num_graphs, 1, 1), jnp.float32),
        in_specs=in_specs,
        out_specs=pl.BlockSpec((1, 1, 1), lambda g: (g, 0, 0)),
        compiler_params=pltpu.CompilerParams(
            dimension_semantics=("parallel",),
            vmem_limit_bytes=32 * 1024 * 1024),
        cost_estimate=pl.CostEstimate(flops=flops,
                                      transcendentals=transcendentals,
                                      bytes_accessed=bytes_accessed),
    )(x, ea_aug, src_local, dst_local, *weights)
    return out.reshape(num_graphs, 1)
    # TODO(synk): add_edge_link branch (EdgeAgg_4) is undefined in the source
    # module and disabled in this configuration, so it is not implemented.


# ----------------------------------------------------------------------------
# Pure-JAX reference (faithful f32 model of the PyTorch forward)
# ----------------------------------------------------------------------------
def reference_forward(x, edge_attr, src, dst, batch, params,
                      *, num_nodes, num_graphs, in_dim, hidden_dim,
                      relu_coef=0.05, out_divide=4.0):
    leaky = lambda v: jnp.where(v >= 0, v, relu_coef * v)

    def nnconv(h, nn_w, nn_b, root_w, root_b, din, dout):
        w = (edge_attr @ nn_w + nn_b).reshape(-1, din, dout)
        msg = jnp.einsum('ei,eio->eo', h[src], w)
        agg = jnp.zeros((num_nodes, dout), jnp.float32).at[dst].add(msg)
        return agg + h @ root_w + root_b

    h1 = leaky(nnconv(x, params['nn1_w'], params['nn1_b'],
                      params['root1_w'], params['root1_b'], in_dim, hidden_dim))
    h2 = leaky(nnconv(h1, params['nn2_w'], params['nn2_b'],
                      params['root2_w'], params['root2_b'], hidden_dim, hidden_dim))
    xc = jnp.concatenate([h2, x], axis=1)
    sig_w = jnp.concatenate([params['sig_wh'], params['sig_wx']], axis=0)
    tanh_w = jnp.concatenate([params['tanh_wh'], params['tanh_wx']], axis=0)
    sx = jnp.clip(xc @ sig_w + params['sig_b'], -30.0, 30.0)
    gated = (1.0 / (1.0 + jnp.exp(sx))) * jnp.tanh(xc @ tanh_w + params['tanh_b'])
    pooled = jnp.zeros((num_graphs, gated.shape[1]), jnp.float32).at[batch].add(gated)
    y = leaky(pooled @ params['f1_w'] + params['f1_b'])
    z = (y @ params['f2_w'] + params['f2_b']) / out_divide
    return 1.0 / (1.0 + jnp.exp(-z))


# ----------------------------------------------------------------------------
# Main
# ----------------------------------------------------------------------------
if __name__ == "__main__":
    # Module hyper-parameters (small, consistent with __init__ defaults)
    in_dim, hidden_dim, edge_dim = 8, 16, 8
    lin_hidden_dim = hidden_dim          # default: lin_hidden_dim = hidden_dim
    out_hidden_dim = 32
    relu_coef, out_divide = 0.05, 4.0

    # Graph batch: 2 graphs, 8 nodes each, 16 intra-graph edges each.
    num_nodes, num_graphs = 16, 2
    edges_per_graph = 16
    num_edges = edges_per_graph * num_graphs

    key = jax.random.PRNGKey(0)
    ks = jax.random.split(key, 20)

    x = jax.random.normal(ks[0], (num_nodes, in_dim), jnp.float32)
    edge_attr = jax.random.normal(ks[1], (num_edges, edge_dim), jnp.float32)
    src0 = jax.random.randint(ks[2], (edges_per_graph,), 0, 8)
    dst0 = jax.random.randint(ks[3], (edges_per_graph,), 0, 8)
    src1 = jax.random.randint(ks[4], (edges_per_graph,), 0, 8) + 8
    dst1 = jax.random.randint(ks[5], (edges_per_graph,), 0, 8) + 8
    src = jnp.concatenate([src0, src1]).astype(jnp.int32)
    dst = jnp.concatenate([dst0, dst1]).astype(jnp.int32)
    batch = jnp.concatenate([jnp.zeros(8, jnp.int32), jnp.ones(8, jnp.int32)])

    # Deterministic parameter init (weights stored as [in, out]; biases [1, out]).
    s = 0.1
    params = {
        # NNConv1: nn = Linear(edge_dim, in_dim*hidden_dim), root Linear(in_dim, hidden_dim)
        'nn1_w': s * jax.random.normal(ks[6], (edge_dim, in_dim * hidden_dim), jnp.float32),
        'nn1_b': s * jax.random.normal(ks[7], (1, in_dim * hidden_dim), jnp.float32),
        'root1_w': s * jax.random.normal(ks[8], (in_dim, hidden_dim), jnp.float32),
        'root1_b': s * jax.random.normal(ks[9], (1, hidden_dim), jnp.float32),
        # NNConv2
        'nn2_w': s * jax.random.normal(ks[10], (edge_dim, hidden_dim * hidden_dim), jnp.float32),
        'nn2_b': s * jax.random.normal(ks[11], (1, hidden_dim * hidden_dim), jnp.float32),
        'root2_w': s * jax.random.normal(ks[12], (hidden_dim, hidden_dim), jnp.float32),
        'root2_b': s * jax.random.normal(ks[13], (1, hidden_dim), jnp.float32),
        # sig_ln / tanh_ln : Linear(hidden_dim + in_dim, lin_hidden_dim), split as [W_h; W_x]
        'sig_wh': s * jax.random.normal(ks[14], (hidden_dim, lin_hidden_dim), jnp.float32),
        'sig_wx': s * jax.random.normal(ks[15], (in_dim, lin_hidden_dim), jnp.float32),
        'sig_b': s * jax.random.normal(ks[16], (1, lin_hidden_dim), jnp.float32),
        'tanh_wh': s * jax.random.normal(ks[17], (hidden_dim, lin_hidden_dim), jnp.float32),
        'tanh_wx': s * jax.random.normal(ks[18], (in_dim, lin_hidden_dim), jnp.float32),
        'tanh_b': s * jax.random.normal(ks[19], (1, lin_hidden_dim), jnp.float32),
    }
    k2 = jax.random.split(jax.random.PRNGKey(1), 4)
    params.update({
        # final_lin1 / final_lin2
        'f1_w': s * jax.random.normal(k2[0], (lin_hidden_dim, out_hidden_dim), jnp.float32),
        'f1_b': s * jax.random.normal(k2[1], (1, out_hidden_dim), jnp.float32),
        'f2_w': s * jax.random.normal(k2[2], (out_hidden_dim, 1), jnp.float32),
        'f2_b': s * jax.random.normal(k2[3], (1, 1), jnp.float32),
    })

    out = gcn_edge_reward_forward(
        x, edge_attr, src, dst, batch, params,
        num_graphs=num_graphs, relu_coef=relu_coef, out_divide=out_divide)
    out = jax.block_until_ready(out)

    ref = reference_forward(
        x, edge_attr, src, dst, batch, params,
        num_nodes=num_nodes, num_graphs=num_graphs,
        in_dim=in_dim, hidden_dim=hidden_dim,
        relu_coef=relu_coef, out_divide=out_divide)
    ref = jax.block_until_ready(ref)

    # Tolerance loosened vs f32 reference: gathered node features and scattered
    # messages are bf16-rounded on the MXU connectivity dots (review item 2).
    np.testing.assert_allclose(np.asarray(out), np.asarray(ref), rtol=2e-2, atol=1e-2)
    assert out.shape == (num_graphs, 1)
    print("KERNEL_OK")
</pallas_src>

<mosaic_0001>
module attributes {stable_mosaic.version = 11 : i64} {
  func.func @_gcn_graph_kernel(%arg0: i32, %arg1: memref<8x8xf32, #tpu.memory_space<vmem>>, %arg2: memref<16x9xf32, #tpu.memory_space<vmem>>, %arg3: memref<16x1xi32, #tpu.memory_space<vmem>>, %arg4: memref<1x1x16xi32, #tpu.memory_space<vmem>>, %arg5: memref<9x128xf32, #tpu.memory_space<vmem>>, %arg6: memref<8x128xf32, #tpu.memory_space<vmem>>, %arg7: memref<128x16xf32, #tpu.memory_space<vmem>>, %arg8: memref<8x16xf32, #tpu.memory_space<vmem>>, %arg9: memref<1x16xf32, #tpu.memory_space<vmem>>, %arg10: memref<9x256xf32, #tpu.memory_space<vmem>>, %arg11: memref<16x256xf32, #tpu.memory_space<vmem>>, %arg12: memref<256x16xf32, #tpu.memory_space<vmem>>, %arg13: memref<16x16xf32, #tpu.memory_space<vmem>>, %arg14: memref<1x16xf32, #tpu.memory_space<vmem>>, %arg15: memref<16x16xf32, #tpu.memory_space<vmem>>, %arg16: memref<8x16xf32, #tpu.memory_space<vmem>>, %arg17: memref<1x16xf32, #tpu.memory_space<vmem>>, %arg18: memref<16x16xf32, #tpu.memory_space<vmem>>, %arg19: memref<8x16xf32, #tpu.memory_space<vmem>>, %arg20: memref<1x16xf32, #tpu.memory_space<vmem>>, %arg21: memref<16x32xf32, #tpu.memory_space<vmem>>, %arg22: memref<1x32xf32, #tpu.memory_space<vmem>>, %arg23: memref<32x1xf32, #tpu.memory_space<vmem>>, %arg24: memref<1x1xf32, #tpu.memory_space<vmem>>, %arg25: memref<1x1x1xf32, #tpu.memory_space<vmem>>) attributes {dimension_semantics = [#tpu.dimension_semantics<parallel>], iteration_bounds = array<i64: 2>, scalar_prefetch = 0 : i64, scratch_operands = 0 : i64, tpu.core_type = #tpu.core_type<tc>, window_params = [{transform_indices = @transform_0, window_bounds = array<i64: 8, 8>}, {transform_indices = @transform_1, window_bounds = array<i64: 16, 9>}, {transform_indices = @transform_2, window_bounds = array<i64: 16, 1>}, {transform_indices = @transform_3, window_bounds = array<i64: 1, 1, 16>}, {pipeline_mode = #tpu.pipeline_mode<synchronous>, transform_indices = @transform_4, window_bounds = array<i64: 9, 128>}, {pipeline_mode = #tpu.pipeline_mode<synchronous>, transform_indices = @transform_5, window_bounds = array<i64: 8, 128>}, {pipeline_mode = #tpu.pipeline_mode<synchronous>, transform_indices = @transform_6, window_bounds = array<i64: 128, 16>}, {pipeline_mode = #tpu.pipeline_mode<synchronous>, transform_indices = @transform_7, window_bounds = array<i64: 8, 16>}, {pipeline_mode = #tpu.pipeline_mode<synchronous>, transform_indices = @transform_8, window_bounds = array<i64: 1, 16>}, {pipeline_mode = #tpu.pipeline_mode<synchronous>, transform_indices = @transform_9, window_bounds = array<i64: 9, 256>}, {pipeline_mode = #tpu.pipeline_mode<synchronous>, transform_indices = @transform_10, window_bounds = array<i64: 16, 256>}, {pipeline_mode = #tpu.pipeline_mode<synchronous>, transform_indices = @transform_11, window_bounds = array<i64: 256, 16>}, {pipeline_mode = #tpu.pipeline_mode<synchronous>, transform_indices = @transform_12, window_bounds = array<i64: 16, 16>}, {pipeline_mode = #tpu.pipeline_mode<synchronous>, transform_indices = @transform_13, window_bounds = array<i64: 1, 16>}, {pipeline_mode = #tpu.pipeline_mode<synchronous>, transform_indices = @transform_14, window_bounds = array<i64: 16, 16>}, {pipeline_mode = #tpu.pipeline_mode<synchronous>, transform_indices = @transform_15, window_bounds = array<i64: 8, 16>}, {pipeline_mode = #tpu.pipeline_mode<synchronous>, transform_indices = @transform_16, window_bounds = array<i64: 1, 16>}, {pipeline_mode = #tpu.pipeline_mode<synchronous>, transform_indices = @transform_17, window_bounds = array<i64: 16, 16>}, {pipeline_mode = #tpu.pipeline_mode<synchronous>, transform_indices = @transform_18, window_bounds = array<i64: 8, 16>}, {pipeline_mode = #tpu.pipeline_mode<synchronous>, transform_indices = @transform_19, window_bounds = array<i64: 1, 16>}, {pipeline_mode = #tpu.pipeline_mode<synchronous>, transform_indices = @transform_20, window_bounds = array<i64: 16, 32>}, {pipeline_mode = #tpu.pipeline_mode<synchronous>, transform_indices = @transform_21, window_bounds = array<i64: 1, 32>}, {pipeline_mode = #tpu.pipeline_mode<synchronous>, transform_indices = @transform_22, window_bounds = array<i64: 32, 1>}, {pipeline_mode = #tpu.pipeline_mode<synchronous>, transform_indices = @transform_23, window_bounds = array<i64: 1, 1>}, {transform_indices = @transform_24, window_bounds = array<i64: 1, 1, 1>}]} {
    %c0 = arith.constant 0 : index
    %c0_0 = arith.constant 0 : index
    %0 = vector.load %arg1[%c0, %c0_0] : memref<8x8xf32, #tpu.memory_space<vmem>>, vector<8x8xf32>
    %c0_1 = arith.constant 0 : index
    %c0_2 = arith.constant 0 : index
    %1 = vector.load %arg2[%c0_1, %c0_2] : memref<16x9xf32, #tpu.memory_space<vmem>>, vector<16x9xf32>
    %c0_3 = arith.constant 0 : index
    %c0_4 = arith.constant 0 : index
    %2 = vector.load %arg3[%c0_3, %c0_4] : memref<16x1xi32, #tpu.memory_space<vmem>>, vector<16x1xi32>
    %c0_5 = arith.constant 0 : index
    %c0_6 = arith.constant 0 : index
    %c0_7 = arith.constant 0 : index
    %3 = vector.load %arg4[%c0_5, %c0_6, %c0_7] : memref<1x1x16xi32, #tpu.memory_space<vmem>>, vector<1x1x16xi32>
    %4 = vector.shape_cast %3 : vector<1x1x16xi32> to vector<1x16xi32>
    %5 = tpu.iota {dimensions = array<i32: 1>} : vector<16x8xi32>
    %6 = vector.broadcast %2 : vector<16x1xi32> to vector<16x8xi32>
    %7 = arith.cmpi eq, %5, %6 : vector<16x8xi32>
    %8 = arith.extui %7 : vector<16x8xi1> to vector<16x8xi32>
    %9 = arith.sitofp %8 : vector<16x8xi32> to vector<16x8xf32>
    %10 = arith.truncf %9 : vector<16x8xf32> to vector<16x8xbf16>
    %11 = tpu.iota {dimensions = array<i32: 0>} : vector<8x16xi32>
    %12 = vector.broadcast %4 : vector<1x16xi32> to vector<8x16xi32>
    %13 = arith.cmpi eq, %11, %12 : vector<8x16xi32>
    %14 = arith.extui %13 : vector<8x16xi1> to vector<8x16xi32>
    %15 = arith.sitofp %14 : vector<8x16xi32> to vector<8x16xf32>
    %16 = arith.truncf %15 : vector<8x16xf32> to vector<8x16xbf16>
    %17 = arith.truncf %0 : vector<8x8xf32> to vector<8x8xbf16>
    %cst = arith.constant dense<0.000000e+00> : vector<16x8xf32>
    %18 = tpu.matmul %10, %17, %cst {dimension_numbers = #tpu.dot_dimension_numbers<[1], [0], [0], [1], [0, 0, 1, 1], [], []>} : vector<16x8xbf16>, vector<8x8xbf16>, vector<16x8xf32> -> vector<16x8xf32>
    %c0_8 = arith.constant 0 : index
    %c0_9 = arith.constant 0 : index
    %19 = vector.load %arg5[%c0_8, %c0_9] : memref<9x128xf32, #tpu.memory_space<vmem>>, vector<9x128xf32>
    %cst_10 = arith.constant dense<0.000000e+00> : vector<16x128xf32>
    %20 = tpu.matmul %1, %19, %cst_10 {dimension_numbers = #tpu.dot_dimension_numbers<[1], [0], [0], [1], [0, 0, 1, 1], [], []>} : vector<16x9xf32>, vector<9x128xf32>, vector<16x128xf32> -> vector<16x128xf32>
    %c0_11 = arith.constant 0 : index
    %c0_12 = arith.constant 0 : index
    %21 = vector.load %arg6[%c0_11, %c0_12] : memref<8x128xf32, #tpu.memory_space<vmem>>, vector<8x128xf32>
    %cst_13 = arith.constant dense<0.000000e+00> : vector<16x128xf32>
    %22 = tpu.matmul %18, %21, %cst_13 {dimension_numbers = #tpu.dot_dimension_numbers<[1], [0], [0], [1], [0, 0, 1, 1], [], []>} : vector<16x8xf32>, vector<8x128xf32>, vector<16x128xf32> -> vector<16x128xf32>
    %23 = arith.mulf %20, %22 : vector<16x128xf32>
    %c0_14 = arith.constant 0 : index
    %c0_15 = arith.constant 0 : index
    %24 = vector.load %arg7[%c0_14, %c0_15] : memref<128x16xf32, #tpu.memory_space<vmem>>, vector<128x16xf32>
    %cst_16 = arith.constant dense<0.000000e+00> : vector<16x16xf32>
    %25 = tpu.matmul %23, %24, %cst_16 {dimension_numbers = #tpu.dot_dimension_numbers<[1], [0], [0], [1], [0, 0, 1, 1], [], []>} : vector<16x128xf32>, vector<128x16xf32>, vector<16x16xf32> -> vector<16x16xf32>
    %26 = arith.truncf %25 : vector<16x16xf32> to vector<16x16xbf16>
    %cst_17 = arith.constant dense<0.000000e+00> : vector<8x16xf32>
    %27 = tpu.matmul %16, %26, %cst_17 {dimension_numbers = #tpu.dot_dimension_numbers<[1], [0], [0], [1], [0, 0, 1, 1], [], []>} : vector<8x16xbf16>, vector<16x16xbf16>, vector<8x16xf32> -> vector<8x16xf32>
    %c0_18 = arith.constant 0 : index
    %c0_19 = arith.constant 0 : index
    %28 = vector.load %arg8[%c0_18, %c0_19] : memref<8x16xf32, #tpu.memory_space<vmem>>, vector<8x16xf32>
    %cst_20 = arith.constant dense<0.000000e+00> : vector<8x16xf32>
    %29 = tpu.matmul %0, %28, %cst_20 {dimension_numbers = #tpu.dot_dimension_numbers<[1], [0], [0], [1], [0, 0, 1, 1], [], []>} : vector<8x8xf32>, vector<8x16xf32>, vector<8x16xf32> -> vector<8x16xf32>
    %30 = arith.addf %27, %29 : vector<8x16xf32>
    %c0_21 = arith.constant 0 : index
    %c0_22 = arith.constant 0 : index
    %31 = vector.load %arg9[%c0_21, %c0_22] : memref<1x16xf32, #tpu.memory_space<vmem>>, vector<1x16xf32>
    %32 = vector.broadcast %31 : vector<1x16xf32> to vector<8x16xf32>
    %33 = arith.addf %30, %32 : vector<8x16xf32>
    %cst_23 = arith.constant 5.000000e-02 : f32
    %34 = vector.broadcast %cst_23 : f32 to vector<8x16xf32>
    %35 = arith.mulf %34, %33 : vector<8x16xf32>
    %36 = arith.maximumf %33, %35 : vector<8x16xf32>
    %37 = arith.truncf %36 : vector<8x16xf32> to vector<8x16xbf16>
    %cst_24 = arith.constant dense<0.000000e+00> : vector<16x16xf32>
    %38 = tpu.matmul %10, %37, %cst_24 {dimension_numbers = #tpu.dot_dimension_numbers<[1], [0], [0], [1], [0, 0, 1, 1], [], []>} : vector<16x8xbf16>, vector<8x16xbf16>, vector<16x16xf32> -> vector<16x16xf32>
    %c0_25 = arith.constant 0 : index
    %c0_26 = arith.constant 0 : index
    %39 = vector.load %arg10[%c0_25, %c0_26] : memref<9x256xf32, #tpu.memory_space<vmem>>, vector<9x256xf32>
    %cst_27 = arith.constant dense<0.000000e+00> : vector<16x256xf32>
    %40 = tpu.matmul %1, %39, %cst_27 {dimension_numbers = #tpu.dot_dimension_numbers<[1], [0], [0], [1], [0, 0, 1, 1], [], []>} : vector<16x9xf32>, vector<9x256xf32>, vector<16x256xf32> -> vector<16x256xf32>
    %c0_28 = arith.constant 0 : index
    %c0_29 = arith.constant 0 : index
    %41 = vector.load %arg11[%c0_28, %c0_29] : memref<16x256xf32, #tpu.memory_space<vmem>>, vector<16x256xf32>
    %cst_30 = arith.constant dense<0.000000e+00> : vector<16x256xf32>
    %42 = tpu.matmul %38, %41, %cst_30 {dimension_numbers = #tpu.dot_dimension_numbers<[1], [0], [0], [1], [0, 0, 1, 1], [], []>} : vector<16x16xf32>, vector<16x256xf32>, vector<16x256xf32> -> vector<16x256xf32>
    %43 = arith.mulf %40, %42 : vector<16x256xf32>
    %c0_31 = arith.constant 0 : index
    %c0_32 = arith.constant 0 : index
    %44 = vector.load %arg12[%c0_31, %c0_32] : memref<256x16xf32, #tpu.memory_space<vmem>>, vector<256x16xf32>
    %cst_33 = arith.constant dense<0.000000e+00> : vector<16x16xf32>
    %45 = tpu.matmul %43, %44, %cst_33 {dimension_numbers = #tpu.dot_dimension_numbers<[1], [0], [0], [1], [0, 0, 1, 1], [], []>} : vector<16x256xf32>, vector<256x16xf32>, vector<16x16xf32> -> vector<16x16xf32>
    %46 = arith.truncf %45 : vector<16x16xf32> to vector<16x16xbf16>
    %cst_34 = arith.constant dense<0.000000e+00> : vector<8x16xf32>
    %47 = tpu.matmul %16, %46, %cst_34 {dimension_numbers = #tpu.dot_dimension_numbers<[1], [0], [0], [1], [0, 0, 1, 1], [], []>} : vector<8x16xbf16>, vector<16x16xbf16>, vector<8x16xf32> -> vector<8x16xf32>
    %c0_35 = arith.constant 0 : index
    %c0_36 = arith.constant 0 : index
    %48 = vector.load %arg13[%c0_35, %c0_36] : memref<16x16xf32, #tpu.memory_space<vmem>>, vector<16x16xf32>
    %cst_37 = arith.constant dense<0.000000e+00> : vector<8x16xf32>
    %49 = tpu.matmul %36, %48, %cst_37 {dimension_numbers = #tpu.dot_dimension_numbers<[1], [0], [0], [1], [0, 0, 1, 1], [], []>} : vector<8x16xf32>, vector<16x16xf32>, vector<8x16xf32> -> vector<8x16xf32>
    %50 = arith.addf %47, %49 : vector<8x16xf32>
    %c0_38 = arith.constant 0 : index
    %c0_39 = arith.constant 0 : index
    %51 = vector.load %arg14[%c0_38, %c0_39] : memref<1x16xf32, #tpu.memory_space<vmem>>, vector<1x16xf32>
    %52 = vector.broadcast %51 : vector<1x16xf32> to vector<8x16xf32>
    %53 = arith.addf %50, %52 : vector<8x16xf32>
    %cst_40 = arith.constant 5.000000e-02 : f32
    %54 = vector.broadcast %cst_40 : f32 to vector<8x16xf32>
    %55 = arith.mulf %54, %53 : vector<8x16xf32>
    %56 = arith.maximumf %53, %55 : vector<8x16xf32>
    %c0_41 = arith.constant 0 : index
    %c0_42 = arith.constant 0 : index
    %57 = vector.load %arg15[%c0_41, %c0_42] : memref<16x16xf32, #tpu.memory_space<vmem>>, vector<16x16xf32>
    %cst_43 = arith.constant dense<0.000000e+00> : vector<8x16xf32>
    %58 = tpu.matmul %56, %57, %cst_43 {dimension_numbers = #tpu.dot_dimension_numbers<[1], [0], [0], [1], [0, 0, 1, 1], [], []>} : vector<8x16xf32>, vector<16x16xf32>, vector<8x16xf32> -> vector<8x16xf32>
    %c0_44 = arith.constant 0 : index
    %c0_45 = arith.constant 0 : index
    %59 = vector.load %arg16[%c0_44, %c0_45] : memref<8x16xf32, #tpu.memory_space<vmem>>, vector<8x16xf32>
    %cst_46 = arith.constant dense<0.000000e+00> : vector<8x16xf32>
    %60 = tpu.matmul %0, %59, %cst_46 {dimension_numbers = #tpu.dot_dimension_numbers<[1], [0], [0], [1], [0, 0, 1, 1], [], []>} : vector<8x8xf32>, vector<8x16xf32>, vector<8x16xf32> -> vector<8x16xf32>
    %61 = arith.addf %58, %60 : vector<8x16xf32>
    %c0_47 = arith.constant 0 : index
    %c0_48 = arith.constant 0 : index
    %62 = vector.load %arg17[%c0_47, %c0_48] : memref<1x16xf32, #tpu.memory_space<vmem>>, vector<1x16xf32>
    %63 = vector.broadcast %62 : vector<1x16xf32> to vector<8x16xf32>
    %64 = arith.addf %61, %63 : vector<8x16xf32>
    %cst_49 = arith.constant -3.000000e+01 : f32
    %cst_50 = arith.constant 3.000000e+01 : f32
    %65 = vector.broadcast %cst_49 : f32 to vector<8x16xf32>
    %66 = arith.maximumf %65, %64 : vector<8x16xf32>
    %67 = vector.broadcast %cst_50 : f32 to vector<8x16xf32>
    %68 = arith.minimumf %67, %66 : vector<8x16xf32>
    %c0_51 = arith.constant 0 : index
    %c0_52 = arith.constant 0 : index
    %69 = vector.load %arg18[%c0_51, %c0_52] : memref<16x16xf32, #tpu.memory_space<vmem>>, vector<16x16xf32>
    %cst_53 = arith.constant dense<0.000000e+00> : vector<8x16xf32>
    %70 = tpu.matmul %56, %69, %cst_53 {dimension_numbers = #tpu.dot_dimension_numbers<[1], [0], [0], [1], [0, 0, 1, 1], [], []>} : vector<8x16xf32>, vector<16x16xf32>, vector<8x16xf32> -> vector<8x16xf32>
    %c0_54 = arith.constant 0 : index
    %c0_55 = arith.constant 0 : index
    %71 = vector.load %arg19[%c0_54, %c0_55] : memref<8x16xf32, #tpu.memory_space<vmem>>, vector<8x16xf32>
    %cst_56 = arith.constant dense<0.000000e+00> : vector<8x16xf32>
    %72 = tpu.matmul %0, %71, %cst_56 {dimension_numbers = #tpu.dot_dimension_numbers<[1], [0], [0], [1], [0, 0, 1, 1], [], []>} : vector<8x8xf32>, vector<8x16xf32>, vector<8x16xf32> -> vector<8x16xf32>
    %73 = arith.addf %70, %72 : vector<8x16xf32>
    %c0_57 = arith.constant 0 : index
    %c0_58 = arith.constant 0 : index
    %74 = vector.load %arg20[%c0_57, %c0_58] : memref<1x16xf32, #tpu.memory_space<vmem>>, vector<1x16xf32>
    %75 = vector.broadcast %74 : vector<1x16xf32> to vector<8x16xf32>
    %76 = arith.addf %73, %75 : vector<8x16xf32>
    %77 = math.exp %68 : vector<8x16xf32>
    %cst_59 = arith.constant 1.000000e+00 : f32
    %78 = vector.broadcast %cst_59 : f32 to vector<8x16xf32>
    %79 = arith.addf %78, %77 : vector<8x16xf32>
    %80 = tpu.reciprocal %79 {approx = true} : vector<8x16xf32> -> vector<8x16xf32>
    %81 = math.tanh %76 : vector<8x16xf32>
    %82 = arith.mulf %80, %81 : vector<8x16xf32>
    %cst_60 = arith.constant dense<0.000000e+00> : vector<16xf32>
    %83 = vector.multi_reduction <add>, %82, %cst_60 [0] : vector<8x16xf32> to vector<16xf32>
    %84 = vector.shape_cast %83 : vector<16xf32> to vector<1x16xf32>
    %c0_61 = arith.constant 0 : index
    %c0_62 = arith.constant 0 : index
    %85 = vector.load %arg21[%c0_61, %c0_62] : memref<16x32xf32, #tpu.memory_space<vmem>>, vector<16x32xf32>
    %cst_63 = arith.constant dense<0.000000e+00> : vector<1x32xf32>
    %86 = tpu.matmul %84, %85, %cst_63 {dimension_numbers = #tpu.dot_dimension_numbers<[1], [0], [0], [1], [0, 0, 1, 1], [], []>} : vector<1x16xf32>, vector<16x32xf32>, vector<1x32xf32> -> vector<1x32xf32>
    %c0_64 = arith.constant 0 : index
    %c0_65 = arith.constant 0 : index
    %87 = vector.load %arg22[%c0_64, %c0_65] : memref<1x32xf32, #tpu.memory_space<vmem>>, vector<1x32xf32>
    %88 = arith.addf %86, %87 : vector<1x32xf32>
    %cst_66 = arith.constant 5.000000e-02 : f32
    %89 = vector.broadcast %cst_66 : f32 to vector<1x32xf32>
    %90 = arith.mulf %89, %88 : vector<1x32xf32>
    %91 = arith.maximumf %88, %90 : vector<1x32xf32>
    %c0_67 = arith.constant 0 : index
    %c0_68 = arith.constant 0 : index
    %92 = vector.load %arg23[%c0_67, %c0_68] : memref<32x1xf32, #tpu.memory_space<vmem>>, vector<32x1xf32>
    %cst_69 = arith.constant dense<0.000000e+00> : vector<1x1xf32>
    %93 = tpu.matmul %91, %92, %cst_69 {dimension_numbers = #tpu.dot_dimension_numbers<[1], [0], [0], [1], [0, 0, 1, 1], [], []>} : vector<1x32xf32>, vector<32x1xf32>, vector<1x1xf32> -> vector<1x1xf32>
    %c0_70 = arith.constant 0 : index
    %c0_71 = arith.constant 0 : index
    %94 = vector.load %arg24[%c0_70, %c0_71] : memref<1x1xf32, #tpu.memory_space<vmem>>, vector<1x1xf32>
    %95 = arith.addf %93, %94 : vector<1x1xf32>
    %cst_72 = arith.constant 0.000000e+00 : f32
    %96 = vector.broadcast %cst_72 : f32 to vector<1x1xf32>
    %97 = arith.subf %96, %95 : vector<1x1xf32>
    %cst_73 = arith.constant 2.500000e-01 : f32
    %98 = vector.broadcast %cst_73 : f32 to vector<1x1xf32>
    %99 = arith.mulf %97, %98 : vector<1x1xf32>
    %100 = math.exp %99 : vector<1x1xf32>
    %cst_74 = arith.constant 1.000000e+00 : f32
    %101 = vector.broadcast %cst_74 : f32 to vector<1x1xf32>
    %102 = arith.addf %101, %100 : vector<1x1xf32>
    %103 = tpu.reciprocal %102 {approx = true} : vector<1x1xf32> -> vector<1x1xf32>
    %c0_75 = arith.constant 0 : index
    %c0_76 = arith.constant 0 : index
    %c0_77 = arith.constant 0 : index
    %104 = vector.load %arg25[%c0_75, %c0_76, %c0_77] : memref<1x1x1xf32, #tpu.memory_space<vmem>>, vector<1x1x1xf32>
    %105 = vector.shape_cast %104 : vector<1x1x1xf32> to vector<1x1xf32>
    %106 = vector.shape_cast %103 : vector<1x1xf32> to vector<1x1x1xf32>
    tpu.vector_store %arg25[%c0_75, %c0_76, %c0_77], %106 {strides = array<i32>} : memref<1x1x1xf32, #tpu.memory_space<vmem>>, vector<1x1x1xf32>,
    return
  }
  func.func @transform_0(%arg0: i32) -> (i32, i32) {
    %c0_i32 = arith.constant 0 : i32
    %c0_i32_0 = arith.constant 0 : i32
    return %arg0, %c0_i32 : i32, i32
  }
  func.func @transform_1(%arg0: i32) -> (i32, i32) {
    %c0_i32 = arith.constant 0 : i32
    %c0_i32_0 = arith.constant 0 : i32
    return %arg0, %c0_i32 : i32, i32
  }
  func.func @transform_2(%arg0: i32) -> (i32, i32) {
    %c0_i32 = arith.constant 0 : i32
    %c0_i32_0 = arith.constant 0 : i32
    return %arg0, %c0_i32 : i32, i32
  }
  func.func @transform_3(%arg0: i32) -> (i32, i32, i32) {
    %c0_i32 = arith.constant 0 : i32
    %c0_i32_0 = arith.constant 0 : i32
    %c0_i32_1 = arith.constant 0 : i32
    return %arg0, %c0_i32, %c0_i32_0 : i32, i32, i32
  }
  func.func @transform_4(%arg0: i32) -> (i32, i32) {
    %c0_i32 = arith.constant 0 : i32
    %c0_i32_0 = arith.constant 0 : i32
    %c0_i32_1 = arith.constant 0 : i32
    return %c0_i32, %c0_i32_0 : i32, i32
  }
  func.func @transform_5(%arg0: i32) -> (i32, i32) {
    %c0_i32 = arith.constant 0 : i32
    %c0_i32_0 = arith.constant 0 : i32
    %c0_i32_1 = arith.constant 0 : i32
    return %c0_i32, %c0_i32_0 : i32, i32
  }
  func.func @transform_6(%arg0: i32) -> (i32, i32) {
    %c0_i32 = arith.constant 0 : i32
    %c0_i32_0 = arith.constant 0 : i32
    %c0_i32_1 = arith.constant 0 : i32
    return %c0_i32, %c0_i32_0 : i32, i32
  }
  func.func @transform_7(%arg0: i32) -> (i32, i32) {
    %c0_i32 = arith.constant 0 : i32
    %c0_i32_0 = arith.constant 0 : i32
    %c0_i32_1 = arith.constant 0 : i32
    return %c0_i32, %c0_i32_0 : i32, i32
  }
  func.func @transform_8(%arg0: i32) -> (i32, i32) {
    %c0_i32 = arith.constant 0 : i32
    %c0_i32_0 = arith.constant 0 : i32
    %c0_i32_1 = arith.constant 0 : i32
    return %c0_i32, %c0_i32_0 : i32, i32
  }
  func.func @transform_9(%arg0: i32) -> (i32, i32) {
    %c0_i32 = arith.constant 0 : i32
    %c0_i32_0 = arith.constant 0 : i32
    %c0_i32_1 = arith.constant 0 : i32
    return %c0_i32, %c0_i32_0 : i32, i32
  }
  func.func @transform_10(%arg0: i32) -> (i32, i32) {
    %c0_i32 = arith.constant 0 : i32
    %c0_i32_0 = arith.constant 0 : i32
    %c0_i32_1 = arith.constant 0 : i32
    return %c0_i32, %c0_i32_0 : i32, i32
  }
  func.func @transform_11(%arg0: i32) -> (i32, i32) {
    %c0_i32 = arith.constant 0 : i32
    %c0_i32_0 = arith.constant 0 : i32
    %c0_i32_1 = arith.constant 0 : i32
    return %c0_i32, %c0_i32_0 : i32, i32
  }
  func.func @transform_12(%arg0: i32) -> (i32, i32) {
    %c0_i32 = arith.constant 0 : i32
    %c0_i32_0 = arith.constant 0 : i32
    %c0_i32_1 = arith.constant 0 : i32
    return %c0_i32, %c0_i32_0 : i32, i32
  }
  func.func @transform_13(%arg0: i32) -> (i32, i32) {
    %c0_i32 = arith.constant 0 : i32
    %c0_i32_0 = arith.constant 0 : i32
    %c0_i32_1 = arith.constant 0 : i32
    return %c0_i32, %c0_i32_0 : i32, i32
  }
  func.func @transform_14(%arg0: i32) -> (i32, i32) {
    %c0_i32 = arith.constant 0 : i32
    %c0_i32_0 = arith.constant 0 : i32
    %c0_i32_1 = arith.constant 0 : i32
    return %c0_i32, %c0_i32_0 : i32, i32
  }
  func.func @transform_15(%arg0: i32) -> (i32, i32) {
    %c0_i32 = arith.constant 0 : i32
    %c0_i32_0 = arith.constant 0 : i32
    %c0_i32_1 = arith.constant 0 : i32
    return %c0_i32, %c0_i32_0 : i32, i32
  }
  func.func @transform_16(%arg0: i32) -> (i32, i32) {
    %c0_i32 = arith.constant 0 : i32
    %c0_i32_0 = arith.constant 0 : i32
    %c0_i32_1 = arith.constant 0 : i32
    return %c0_i32, %c0_i32_0 : i32, i32
  }
  func.func @transform_17(%arg0: i32) -> (i32, i32) {
    %c0_i32 = arith.constant 0 : i32
    %c0_i32_0 = arith.constant 0 : i32
    %c0_i32_1 = arith.constant 0 : i32
    return %c0_i32, %c0_i32_0 : i32, i32
  }
  func.func @transform_18(%arg0: i32) -> (i32, i32) {
    %c0_i32 = arith.constant 0 : i32
    %c0_i32_0 = arith.constant 0 : i32
    %c0_i32_1 = arith.constant 0 : i32
    return %c0_i32, %c0_i32_0 : i32, i32
  }
  func.func @transform_19(%arg0: i32) -> (i32, i32) {
    %c0_i32 = arith.constant 0 : i32
    %c0_i32_0 = arith.constant 0 : i32
    %c0_i32_1 = arith.constant 0 : i32
    return %c0_i32, %c0_i32_0 : i32, i32
  }
  func.func @transform_20(%arg0: i32) -> (i32, i32) {
    %c0_i32 = arith.constant 0 : i32
    %c0_i32_0 = arith.constant 0 : i32
    %c0_i32_1 = arith.constant 0 : i32
    return %c0_i32, %c0_i32_0 : i32, i32
  }
  func.func @transform_21(%arg0: i32) -> (i32, i32) {
    %c0_i32 = arith.constant 0 : i32
    %c0_i32_0 = arith.constant 0 : i32
    %c0_i32_1 = arith.constant 0 : i32
    return %c0_i32, %c0_i32_0 : i32, i32
  }
  func.func @transform_22(%arg0: i32) -> (i32, i32) {
    %c0_i32 = arith.constant 0 : i32
    %c0_i32_0 = arith.constant 0 : i32
    %c0_i32_1 = arith.constant 0 : i32
    return %c0_i32, %c0_i32_0 : i32, i32
  }
  func.func @transform_23(%arg0: i32) -> (i32, i32) {
    %c0_i32 = arith.constant 0 : i32
    %c0_i32_0 = arith.constant 0 : i32
    %c0_i32_1 = arith.constant 0 : i32
    return %c0_i32, %c0_i32_0 : i32, i32
  }
  func.func @transform_24(%arg0: i32) -> (i32, i32, i32) {
    %c0_i32 = arith.constant 0 : i32
    %c0_i32_0 = arith.constant 0 : i32
    %c0_i32_1 = arith.constant 0 : i32
    return %arg0, %c0_i32, %c0_i32_0 : i32, i32, i32
  }
}

</mosaic_0001>

<bundles_post_ra>
// kernel: tpu_custom_call.1
= control target key start
LH: loop header
LB: loop body
LE: loop exit
PB: predicated region body
PF: predicated region fallthrough
CT: control target
= control target key end

     0   :  { %s2812_s27 = smov 0   ;;  %s3195_s0 = inlined_call_operand.vmem [shape: f32[16,8], index: 0, kind: input, shape index: {}]   ;;  %s3196_s1 = inlined_call_operand.vmem [shape: f32[32,9], index: 1, kind: input, shape index: {}]   ;;  %s3197_s2 = inlined_call_operand.vmem [shape: s32[32,1], index: 2, kind: input, shape index: {}]   ;;  %s3198_s3 = inlined_call_operand.vmem [shape: s32[2,1,16], index: 3, kind: input, shape index: {}]   ;;  %s3199_s4 = inlined_call_operand.vmem [shape: f32[9,128], index: 4, kind: input, shape index: {}]   ;;  %s3200_s5 = inlined_call_operand.vmem [shape: f32[8,128], index: 5, kind: input, shape index: {}]   ;;  %s3201_s6 = inlined_call_operand.vmem [shape: f32[128,16], index: 6, kind: input, shape index: {}]   ;;  %s3202_s7 = inlined_call_operand.vmem [shape: f32[8,16], index: 7, kind: input, shape index: {}]   ;;  %s3203_s8 = inlined_call_operand.vmem [shape: f32[1,16], index: 8, kind: input, shape index: {}]   ;;  %s3204_s9 = inlined_call_operand.vmem [shape: f32[9,256], index: 9, kind: input, shape index: {}]   ;;  %s3205_s10 = inlined_call_operand.vmem [shape: f32[16,256], index: 10, kind: input, shape index: {}]   ;;  %s3206_s11 = inlined_call_operand.vmem [shape: f32[256,16], index: 11, kind: input, shape index: {}]   ;;  %s3207_s12 = inlined_call_operand.vmem [shape: f32[16,16], index: 12, kind: input, shape index: {}]   ;;  %s3208_s13 = inlined_call_operand.vmem [shape: f32[1,16], index: 13, kind: input, shape index: {}]   ;;  %s3209_s14 = inlined_call_operand.vmem [shape: f32[16,16], index: 14, kind: input, shape index: {}]   ;;  %s3210_s15 = inlined_call_operand.vmem [shape: f32[8,16], index: 15, kind: input, shape index: {}]   ;;  %s3211_s16 = inlined_call_operand.vmem [shape: f32[1,16], index: 16, kind: input, shape index: {}]   ;;  %s3212_s17 = inlined_call_operand.vmem [shape: f32[16,16], index: 17, kind: input, shape index: {}]   ;;  %s3213_s18 = inlined_call_operand.vmem [shape: f32[8,16], index: 18, kind: input, shape index: {}]   ;;  %s3214_s19 = inlined_call_operand.vmem [shape: f32[1,16], index: 19, kind: input, shape index: {}]   ;;  %s3215_s20 = inlined_call_operand.vmem [shape: f32[16,32], index: 20, kind: input, shape index: {}]   ;;  %s3216_s21 = inlined_call_operand.vmem [shape: f32[1,32], index: 21, kind: input, shape index: {}]   ;;  %s3217_s22 = inlined_call_operand.vmem [shape: f32[32,1], index: 22, kind: input, shape index: {}]   ;;  %s3218_s23 = inlined_call_operand.<no memory space> [shape: f32[1,1], index: 23, kind: input, shape index: {}]   ;;  %s3219_s24 = inlined_call_operand.vmem [shape: f32[2,1,1], index: 24, kind: output, shape index: {}]  }
   0x1   :  { %3222 = sst [smem:[#allocation3_spill]] %s3195_s0  ;;  %v29_v0 = vstv %s3218_s23 }
   0x2   :  { %3223 = sst [smem:[#allocation4_spill]] %s3196_s1  ;;  %30 = vst [vmem:[#allocation2] sm:$0x1] %v29_v0 }
   0x3   :  { %3224 = sst [smem:[#allocation5_spill]] %s3197_s2 }
   0x4   :  { %3225 = sst [smem:[#allocation6_spill]] %s3198_s3 }
   0x5   :  { %3226 = sst [smem:[#allocation7_spill]] %s3199_s4 }
   0x6   :  { %3227 = sst [smem:[#allocation8_spill]] %s3200_s5 }
   0x7   :  { %3228 = sst [smem:[#allocation9_spill]] %s3201_s6 }
   0x8   :  { %3229 = sst [smem:[#allocation10_spill]] %s3202_s7 }
   0x9   :  { %3230 = sst [smem:[#allocation11_spill]] %s3203_s8 }
   0xa LB: > { %s2286_s28 = sadd.s32 4294967295, %s2677_s27   ;;  %p2290_p0 = scmp.ge.s32.totalorder %s2677_s27, 1  ;;  %s2677_s27 = sphi %s2812_s27, %s36_s27  }
   0xb   : > { %p693_p1 = scmp.lt.s32.totalorder %s2677_s27, 3 }
   0xd   : > { %p694_p2 = pnand %p2290_p0, %p693_p1 }
   0xe   : > { %s2292_s6 = sshll.u32 (!%p694_p2), %s2286_s28, 1  ;;  %v2679_v1 = vmov (!%p694_p2), 0   ;;  %v2680_v2 = vmov (!%p694_p2), 0.0   ;;  %p769_p4 = scmp.lt.s32.totalorder (!%p694_p2), %s2286_s28, 1  ;;  %v798_v3 = vlaneseq (!%p694_p2)  ;;  %vm828_vm1 = vcmask (!%p694_p2), 1043456   ;;  %v1488_v14 = vld [vmem:[%s3206_s11] sm:$0xff] (!%p694_p2) }
   0xf   : > { %697 = sbr.rel (%p694_p2) target bundleno = 2630 (0xa46), region = 116  ;;  %2660 = vset.pattern.permute.xlu0 (!%p694_p2), %v2679_v1  ;;  %p774_p3 = scmp.lt.s32.totalorder (!%p694_p2), %s2292_s6, 3  ;;  %2424 = vmatprep.subr.bf16.mxu0 (!%p694_p2), %v2680_v2  ;;  %vm2681_vm2 = vmmov (!%p694_p2), 0   ;;  %vm882_vm3 = vcmask (!%p694_p2), 1040384   ;;  %vm875_vm4 = vcmask (!%p694_p2), 72704   ;;  %vm2682_vm5 = vmmov (!%p694_p2), 1  }
  0x10   : > { %s3231_s0 = sld [smem:[#allocation5_spill]] (!%p694_p2)  ;;  %v2824_v5 = vshrl.u32 (!%p694_p2), %v798_v3, 7  ;;  %s3232_s25 = sld [smem:[#allocation6_spill]] (!%p694_p2)  ;;  %2426 = vmatprep.mubr.msk.bf16.mxu0 (!%p694_p2), %vm2681_vm2, %v2680_v2  ;;  %vm2856_vm6 = vmpackc.low (!%p694_p2), %vm882_vm3, %vm2682_vm5  ;;  %v799_v17 = vand.u32 (!%p694_p2), 127, %v798_v3  ;;  %vm824_vm9 = vcmask (!%p694_p2), 64512   ;;  %vm1211_vm10 = vcmask (!%p694_p2), 130048  }
  0x11   : > { %s3233_s26 = sld [smem:[#allocation3_spill]] (!%p694_p2)  ;;  %s3238_s5 = sld [smem:[#allocation8_spill]] (!%p694_p2)  ;;  %v1398_v3 = vld [vmem:[%s3205_s10 + $0x8] sm:$0xff] (!%p694_p2)  ;;  %vm2124_vm11 = vcmask (!%p694_p2), 261120   ;;  %vm2204_vm12 = vcmask (!%p694_p2), 0  }
  0x12   : > { %s3239_s2 = sld [smem:[#allocation9_spill]] (!%p694_p2)  ;;  %s3240_s1 = sld [smem:[#allocation10_spill]] (!%p694_p2) }
  0x16   : > { %s3243_s6 = smov (!%p774_p3, %s2292_s6), 3  ;;  %s3245_s28 = smov (!%p769_p4, %s2286_s28), 1 }
  0x17   : > { %s2293_s23 = sshll.u32 %s3243_s6, 3  ;;  %s787_s8 = scalar_lea.vmem %s3232_s25, %s3245_s28  ;;  %v961_v23 = vld [vmem:[%s3238_s5] sm:$0xff] }
  0x18   : > { %s783_s7 = scalar_lea.vmem %s3231_s0, %s2293_s23  ;;  %v2832_v7 = vld [vmem:[%s787_s8] ss:$0 sm:$0xff]  ;;  %s2291_s4 = sshll.u32 %s3245_s28, 3  ;;  %v1046_v25 = vld [vmem:[%s3239_s2 + $0x8] sm:$0xff]  ;;  %v1047_v26 = vld [vmem:[%s3239_s2 + $0x10] sm:$0xff] }
  0x19   : > { %v795_v4 = vld [vmem:[%s783_s7] sm:$0xff]  ;;  %v796_v6 = vld [vmem:[%s783_s7 + $0x8] sm:$0xff]  ;;  %vm819_vm0 = vcmp.eq.s32.totalorder %v2824_v5, %v2832_v7  ;;  %s772_s6 = scalar_lea.vmem %s3233_s26, %s2291_s4  ;;  %s3234_s0 = sld [smem:[#allocation7_spill]]  ;;  %v1048_v28 = vld [vmem:[%s3239_s2 + $0x18] sm:$0xff] }
  0x1a   : > { %801 = vperm.xlu0 %2660, %v795_v4   ;;  %v2840_v8 = vld [vmem:[%s772_s6] sm:$0xff]  ;;  %s3235_s8 = sld [smem:[#allocation4_spill]]  ;;  %v2559_v29 = vpack.c.bf16 %v1048_v28, %v1047_v26  ;;  %v1050_v31 = vld [vmem:[%s3239_s2 + $0x28] sm:$0xff]  ;;  %v1051_v35 = vld [vmem:[%s3239_s2 + $0x30] sm:$0xff]  ;;  %v2299_v59 = vsel %vm819_vm0, 1.0, %v2680_v2  ;;  %s790_s26 = scalar_lea.vmem %s3219_s24, %s3245_s28 }
  0x1b   : > { %v823_v9 = vpack.c.bf16 %v2840_v8, %v2840_v8  ;;  %v1045_v24 = vld [vmem:[%s3239_s2] sm:$0xff]  ;;  %v1052_v36 = vld [vmem:[%s3239_s2 + $0x38] sm:$0xff]  ;;  %v1054_v39 = vld [vmem:[%s3239_s2 + $0x48] sm:$0xff]  ;;  %v2947_v63 = vpack.c.bf16 %v2299_v59, %v2299_v59 }
  0x1c   : > { %v2555_v27 = vpack.c.bf16 %v1046_v25, %v1045_v24  ;;  %v1049_v30 = vld [vmem:[%s3239_s2 + $0x20] sm:$0xff]  ;;  %v2567_v37 = vpack.c.bf16 %v1052_v36, %v1051_v35  ;;  %v1055_v41 = vld [vmem:[%s3239_s2 + $0x50] sm:$0xff]  ;;  %v1056_v42 = vld [vmem:[%s3239_s2 + $0x58] sm:$0xff] }
  0x1d   : > { %v830_v10 = vsel %vm828_vm1, %v823_v9, 0  ;;  %v2563_v33 = vpack.c.bf16 %v1050_v31, %v1049_v30  ;;  %v1053_v38 = vld [vmem:[%s3239_s2 + $0x40] sm:$0xff]  ;;  %v2575_v43 = vpack.c.bf16 %v1056_v42, %v1055_v41  ;;  %v1058_v45 = vld [vmem:[%s3239_s2 + $0x68] sm:$0xff]  ;;  %v1059_v51 = vld [vmem:[%s3239_s2 + $0x70] sm:$0xff] }
  0x1e   : > { %804 = vperm.xlu0 %2660, %v796_v6   ;;  %2425 = vmatpush3.bf16.msra.mxu0 %v830_v10  ;;  %v2571_v40 = vpack.c.bf16 %v1054_v39, %v1053_v38  ;;  %v1057_v44 = vld [vmem:[%s3239_s2 + $0x60] sm:$0xff]  ;;  %v1060_v52 = vld [vmem:[%s3239_s2 + $0x78] sm:$0xff]  ;;  %v1399_v7 = vld [vmem:[%s3205_s10 + $0x10] sm:$0xff] }
  0x1f   : > { %v873_v11 = vld [vmem:[%s3234_s0] sm:$0xff]  ;;  %v874_v12 = vld [vmem:[%s3234_s0 + $0x8] sm:$0x1]  ;;  %2556 = vmatprep.subr.bf16.mxu0 %v2555_v27  ;;  %v2579_v46 = vpack.c.bf16 %v1058_v45, %v1057_v44  ;;  %v2583_v53 = vpack.c.bf16 %v1060_v52, %v1059_v51  ;;  %v1400_v4 = vld [vmem:[%s3205_s10 + $0x18] sm:$0xff] }
  0x20   : > { %s777_s4 = scalar_lea.vmem %s3235_s8, %s2293_s23  ;;  %v2549_v13 = vpack.c.bf16 %v874_v12, %v873_v11  ;;  %v1137_v58 = vld [vmem:[%s3240_s1] sm:$0xff]  ;;  %v2593_v5 = vpack.c.bf16 %v1400_v4, %v1398_v3  ;;  %s3241_s23 = sld [smem:[#allocation11_spill]]  ;;  %v1312_v28 = vld [vmem:[%s3204_s9 + $0x10] sm:$0x1]  ;;  %v1509_v39 = vld [vmem:[%s3206_s11 + $0xa8] sm:$0xff] }
  0x21   : > { %v2860_v15 = vld [vmem:[%s777_s4] sm:$0xff]  ;;  %v2868_v16 = vld [vmem:[%s777_s4 + $0x8] sm:$0xff]  ;;  %v1490_v36 = vld [vmem:[%s3206_s11 + $0x10] sm:$0xff] }
  0x22   : > { %2434 = vmatprep.mubr.msk.f32.mxu1 %vm875_vm4, %v2860_v15  ;;  %2551 = vmatprep.subr.msk.bf16.mxu1 %vm2856_vm6, %v2549_v13  ;;  %v1397_v6 = vld [vmem:[%s3205_s10] sm:$0xff]  ;;  %v1510_v44 = vld [vmem:[%s3206_s11 + $0xb0] sm:$0xff]  ;;  %v1511_v45 = vld [vmem:[%s3206_s11 + $0xb8] sm:$0xff] }
  0x23   : > { %2554 = vmatpush3.bf16.msk.msra.mxu1 %vm2856_vm6, %v2549_v13  ;;  %v2595_v9 = vpack.c.bf16 %v1399_v7, %v1397_v6  ;;  %v1504_v31 = vld [vmem:[%s3206_s11 + $0x80] sm:$0xff]  ;;  %v1513_v51 = vld [vmem:[%s3206_s11 + $0xc8] sm:$0xff] }
  0x24   : > { %2437 = vmatprep.subr.mxu1 %v961_v23  ;;  %v1508_v38 = vld [vmem:[%s3206_s11 + $0xa0] sm:$0xff] }
  0x25   : > { %v2605_v41 = vpack.c.bf16 %v1509_v39, %v1508_v38  ;;  %v1492_v42 = vld [vmem:[%s3206_s11 + $0x20] sm:$0xff] }
  0x26   : > { %2435 = vmatmul.mubr.msk.f32.vlgmr.msra.gmra.mrb[0].mxu1 %vm875_vm4, %v2868_v16  ;;  %v2308_v11 = vld [vmem:[%s3241_s23] ss:$0 sm:$0xff] }
  0x27   : > { %2438 = vmatpush3.msra.mxu1 %v961_v23  ;;  %v1313_v23 = vld [vmem:[%s3204_s9 + $0x18] sm:$0x1]  ;;  %v1500_v4 = vld [vmem:[%s3206_s11 + $0x60] sm:$0xff] }
  0x28   : > { %2477 = vmatprep.subr.mxu1 %v2680_v2 }
  0x99   : > { %v802_v18 = vpop.permute.xlu0 %801 }
  0x9a   : > { %vm806_vm7 = vcmp.eq.s32.totalorder %v799_v17, %v802_v18 }
  0x9b   : > { %v2296_v20 = vsel %vm806_vm7, 1.0, %v2680_v2 }
  0x9d   : > { %v805_v19 = vpop.permute.xlu0 %804 }
  0x9e   : > { %vm807_vm8 = vcmp.eq.s32.totalorder %v799_v17, %v805_v19 }
  0x9f   : > { %v2297_v21 = vsel %vm807_vm8, 1.0, %v2680_v2 }
  0xa0   : > { %v2874_v22 = vpack.c.bf16 %v2297_v21, %v2296_v20  ;;  %v1311_v21 = vld [vmem:[%s3204_s9 + $0x8] sm:$0xff] }
  0xa1   : > { %v2587_v26 = vpack.c.bf16 %v1313_v23, %v1311_v21  ;;  %v1503_v21 = vld [vmem:[%s3206_s11 + $0x78] sm:$0xff] }
  0xa2   : > { %2427 = vmatmul.mubr.msk.bf16.vlgmr.msra.gmra.mrb[0].mxu0 %vm824_vm9, %v2874_v22 }
  0xa3   : > { %2558 = vmatpush3.bf16.msra.mxu0 %v2555_v27  ;;  %v1310_v27 = vld [vmem:[%s3204_s9] sm:$0xff] }
  0xa4   : > { %2560 = vmatprep.subr.bf16.mxu0 %v2559_v29  ;;  %v2590_v30 = vpack.c.bf16 %v1312_v28, %v1310_v27  ;;  %v2683_v27 = vmov 0.0|0.0   ;;  %v1596_v28 = vld [vmem:[%s3207_s12] sm:$0xff] }
  0xa7   : > { %2562 = vmatpush3.bf16.msra.mxu0 %v2559_v29 }
  0xa8   : > { %2564 = vmatprep.subr.bf16.mxu0 %v2563_v33 }
  0xab   : > { %2566 = vmatpush3.bf16.msra.mxu0 %v2563_v33  ;;  %v1507_v33 = vld [vmem:[%s3206_s11 + $0x98] sm:$0xff] }
  0xac   : > { %2568 = vmatprep.subr.bf16.mxu0 %v2567_v37 }
  0xaf   : > { %2570 = vmatpush3.bf16.msra.mxu0 %v2567_v37  ;;  %v1491_v37 = vld [vmem:[%s3206_s11 + $0x18] sm:$0xff] }
  0xb0   : > { %2572 = vmatprep.subr.bf16.mxu0 %v2571_v40 }
  0xb3   : > { %2574 = vmatpush3.bf16.msra.mxu0 %v2571_v40  ;;  %v2603_v40 = vpack.c.bf16 %v1491_v37, %v1490_v36 }
  0xb4   : > { %2576 = vmatprep.subr.bf16.mxu0 %v2575_v43 }
  0xb7   : > { %2578 = vmatpush3.bf16.msra.mxu0 %v2575_v43  ;;  %v1493_v43 = vld [vmem:[%s3206_s11 + $0x28] sm:$0xff] }
  0xb8   : > { %2580 = vmatprep.subr.bf16.mxu0 %v2579_v46 }
  0xbb   : > { %2582 = vmatpush3.bf16.msra.mxu0 %v2579_v46  ;;  %v2607_v46 = vpack.c.bf16 %v1493_v43, %v1492_v42 }
  0xbc   : > { %2584 = vmatprep.subr.bf16.mxu0 %v2583_v53 }
  0xbf   : > { %2586 = vmatpush3.bf16.msra.mxu0 %v2583_v53 }
  0xc0   : > { %2594 = vmatprep.subr.bf16.mxu0 %v2593_v5  ;;  %v1501_v5 = vld [vmem:[%s3206_s11 + $0x68] sm:$0xff] }
  0xc1   : > { %v2623_v6 = vpack.c.bf16 %v1501_v5, %v1500_v4 }
  0xf9   : > { %v2436_v32 = vpop.f32.mrb[0].mxu1 }
  0xfa   : > { %v952_v34 = vpop.f32.mrb[1].mxu1 }
 0x175   : > { %v866_v47 = vpop.f32.mrb[0].mxu0 }
 0x176   : > { %v2428_v48 = vpop.f32.mrb[1].mxu0  ;;  %2439 = vmatprep.mubr.msk.f32.mxu1 %vm824_vm9, %v866_v47  ;;  %v2609_v47 = vpack.c.bf16 %v1511_v45, %v1510_v44  ;;  %v1721_v44 = vld [vmem:[%s3209_s14] sm:$0xff]  ;;  %v1722_v45 = vld [vmem:[%s3209_s14 + $0x8] sm:$0xff] }
 0x177   : > { %v869_v49 = vpop.f32.mrb[2].mxu0  ;;  %v1494_v48 = vld [vmem:[%s3206_s11 + $0x30] sm:$0xff] }
 0x178   : > { %v2429_v50 = vpop.f32.mrb[3].mxu0  ;;  %2440 = vmatmul.mubr.msk.f32.vlgmr.msra.gmra.mrb[2].mxu1 %vm824_vm9, %v869_v49  ;;  %v1495_v49 = vld [vmem:[%s3206_s11 + $0x38] sm:$0xff] }
 0x179   : > { %2479 = vmatprep.mubr.msk.f32.mxu1 %vm2681_vm2, %v2680_v2  ;;  %2478 = vmatpush3.msra.mxu1 %v1137_v58  ;;  %v1512_v50 = vld [vmem:[%s3206_s11 + $0xc0] sm:$0xff]  ;;  %v2611_v52 = vpack.c.bf16 %v1495_v49, %v1494_v48 }
 0x17a   : > { %2482 = vmatprep.subr.bf16.mxu1 %v2680_v2  ;;  %v2613_v53 = vpack.c.bf16 %v1513_v51, %v1512_v50 }
 0x17c   : > { %2480 = vmatmul.mubr.msk.f32.vlgmr.msra.gmra.mrb[4].mxu1 %vm824_vm9, %v2840_v8 }
 0x17d   : > { %2484 = vmatprep.mubr.msk.bf16.mxu1 %vm2681_vm2, %v2680_v2 }
 0x24b   : > { %v2441_v54 = vpop.f32.mrb[2].mxu1 }
 0x24c   : > { %v1044_v55 = vmul.f32 %v2441_v54, %v2436_v32  ;;  %v1034_v56 = vpop.f32.mrb[3].mxu1  ;;  %v1496_v54 = vld [vmem:[%s3206_s11 + $0x40] sm:$0xff] }
 0x24d   : > { %v1043_v57 = vmul.f32 %v1034_v56, %v952_v34  ;;  %v1514_v56 = vld [vmem:[%s3206_s11 + $0xd0] sm:$0xff] }
 0x24f   : > { %2474 = vmatprep.mubr.f32.mxu0 %v1043_v57  ;;  %v1207_v0 = vpop.f32.mrb[4].mxu1  ;;  %v1515_v57 = vld [vmem:[%s3206_s11 + $0xd8] sm:$0xff] }
 0x250   : > { %2475 = vmatmul.mubr.f32.vlgmr.msra.gmra.mrb[4].mxu0 %v1044_v55  ;;  %v2481_v1 = vpop.f32.mrb[5].mxu1  ;;  %v1497_v55 = vld [vmem:[%s3206_s11 + $0x48] sm:$0xff]  ;;  %v2617_v59 = vpack.c.bf16 %v1515_v57, %v1514_v56  ;;  %v1877_v56 = vld [vmem:[%s3212_s17] sm:$0xff] }
 0x251   : > { %1471 = vmatprep.mubr.f32.mxu0 %v2680_v2  ;;  %2596 = vmatpush1.bf16.msra.mxu0 %v2595_v9  ;;  %v2615_v58 = vpack.c.bf16 %v1497_v55, %v1496_v54  ;;  %v1879_v55 = vld [vmem:[%s3213_s18] sm:$0xff]  ;;  %v1878_v57 = vld [vmem:[%s3212_s17 + $0x8] sm:$0xff] }
 0x252   : > { %2501 = vmatprep.subr.bf16.mxu0 %v2680_v2 }
 0x323   : > { %v2476_v60 = vpop.f32.mrb[4].mxu0 }
 0x324   : > { %v1127_v61 = vpop.f32.mrb[5].mxu0 }
 0x325   : > { %v1136_v62 = vpack.c.bf16 %v2476_v60, %v1127_v61  ;;  %v1498_v60 = vld [vmem:[%s3206_s11 + $0x50] sm:$0xff]  ;;  %v1499_v61 = vld [vmem:[%s3206_s11 + $0x58] sm:$0xff] }
 0x326   : > { %v2619_v1 = vpack.c.bf16 %v1499_v61, %v1498_v60  ;;  %v2041_v61 = vld [vmem:[%s3215_s20] sm:$0xff] }
 0x327   : > { %2483 = vmatpush3.bf16.msra.mxu1 %v1136_v62  ;;  %v1516_v62 = vld [vmem:[%s3206_s11 + $0xe0] sm:$0xff] }
 0x328   : > { %2488 = vmatprep.subr.bf16.mxu1 %v2680_v2 }
 0x32a   : > { %2485 = vmatmul.mubr.msk.bf16.vlgmr.msra.gmra.mrb[8].mxu1 %vm1211_vm10, %v2947_v63 }
 0x32b   : > { %2490 = vmatprep.mubr.msk.bf16.mxu1 %vm2681_vm2, %v2680_v2 }
 0x3fd   : > { %v1249_v10 = vpop.f32.mrb[8].mxu1 }
 0x3fe   : > { %v1250_v12 = vadd.f32 %v1249_v10, %v1207_v0  ;;  %v2486_v13 = vpop.f32.mrb[9].mxu1  ;;  %v1517_v0 = vld [vmem:[%s3206_s11 + $0xe8] sm:$0xff] }
 0x3ff   : > { %v1252_v17 = vpop.f32.mrb[10].mxu1  ;;  %v2621_v3 = vpack.c.bf16 %v1517_v0, %v1516_v62 }
 0x400   : > { %v1262_v18 = vadd.f32 %v2308_v11, %v1250_v12  ;;  %v2487_v19 = vpop.f32.mrb[11].mxu1  ;;  %v1518_v17 = vld [vmem:[%s3206_s11 + $0xf0] sm:$0xff] }
 0x402   : > { %v1263_v20 = vmul.f32 0.05, %v1262_v18 }
 0x404   : > { %v2976_v24 = vmax.f32 %v1262_v18, %v1263_v20  ;;  %v1519_v18 = vld [vmem:[%s3206_s11 + $0xf8] sm:$0xff]  ;;  %v1502_v20 = vld [vmem:[%s3206_s11 + $0x70] sm:$0xff] }
 0x405   : > { %v2625_v19 = vpack.c.bf16 %v1519_v18, %v1518_v17  ;;  %v2627_v23 = vpack.c.bf16 %v1503_v21, %v1502_v20 }
 0x406   : > { %v1265_v25 = vpack.c.bf16 %v2976_v24, %v2976_v24 }
 0x408   : > { %v1267_v29 = vsel %vm828_vm1, %v1265_v25, 0 }
 0x409   : > { %2489 = vmatpush3.bf16.msra.mxu1 %v1267_v29  ;;  %v1597_v29 = vld [vmem:[%s3207_s12 + $0x8] sm:$0xff] }
 0x40a   : > { %2589 = vmatprep.subr.msk.bf16.mxu1 %vm2856_vm6, %v2587_v26 }
 0x40c   : > { %2491 = vmatmul.mubr.msk.bf16.vlgmr.msra.gmra.mrb[12].mxu1 %vm824_vm9, %v2874_v22  ;;  %v1505_v22 = vld [vmem:[%s3206_s11 + $0x88] sm:$0xff] }
 0x40d   : > { %2592 = vmatpush1.bf16.msk.msra.mxu1 %vm2856_vm6, %v2590_v30  ;;  %1384 = vmatprep.mubr.f32.mxu1 %v2680_v2  ;;  %v2597_v32 = vpack.c.bf16 %v1505_v22, %v1504_v31 }
 0x40f   : > { %2598 = vmatprep.subr.bf16.mxu1 %v2597_v32  ;;  %v2630_v32 = vpack.c.bf16 %v1597_v29, %v1596_v28 }
 0x414   : > { %2312 = vmatmul.mubr.msk.f32.vlgmr.msra.gmra.mrb[6].mxu1 %vm875_vm4, %v2860_v15  ;;  %v1489_v15 = vld [vmem:[%s3206_s11 + $0x8] sm:$0xff] }
 0x415   : > { %1390 = vmatprep.mubr.f32.mxu1 %v2680_v2  ;;  %v2599_v34 = vpack.c.bf16 %v1489_v15, %v1488_v14 }
 0x417   : > { %2600 = vmatpush3.bf16.msra.mxu1 %v2599_v34 }
 0x418   : > { %2313 = vmatmul.mubr.msk.f32.gmra.mrb[16].mxu1 %vm875_vm4, %v2868_v16  ;;  %v1506_v16 = vld [vmem:[%s3206_s11 + $0x90] sm:$0xff] }
 0x419   : > { %v2601_v35 = vpack.c.bf16 %v1507_v33, %v1506_v16 }
 0x41b   : > { %2602 = vmatprep.subr.bf16.mxu1 %v2601_v35 }
 0x41c   : > { %2604 = vmatpush3.bf16.msra.mxu1 %v2603_v40 }
 0x41d   : > { %2606 = vmatprep.subr.bf16.mxu1 %v2605_v41 }
 0x420   : > { %2608 = vmatpush3.bf16.msra.mxu1 %v2607_v46 }
 0x421   : > { %2610 = vmatprep.subr.bf16.mxu1 %v2609_v47  ;;  %v2318_v47 = vld [vmem:[%s3208_s13] ss:$0 sm:$0xff] }
 0x424   : > { %2612 = vmatpush3.bf16.msra.mxu1 %v2611_v52 }
 0x425   : > { %2614 = vmatprep.subr.bf16.mxu1 %v2613_v53 }
 0x428   : > { %2616 = vmatpush3.bf16.msra.mxu1 %v2615_v58  ;;  %v2636_v58 = vpack.c.bf16 %v1878_v57, %v1877_v56 }
 0x429   : > { %2618 = vmatprep.subr.bf16.mxu1 %v2617_v59 }
 0x42c   : > { %2620 = vmatpush3.bf16.msra.mxu1 %v2619_v1  ;;  %v2321_v1 = vld [vmem:[%s3211_s16] ss:$0 sm:$0xff] }
 0x42d   : > { %2622 = vmatprep.subr.bf16.mxu1 %v2621_v3 }
 0x430   : > { %2624 = vmatpush3.bf16.msra.mxu1 %v2623_v6 }
 0x431   : > { %2626 = vmatprep.subr.bf16.mxu1 %v2625_v19 }
 0x434   : > { %2628 = vmatpush3.bf16.msra.mxu1 %v2627_v23 }
 0x435   : > { %2629 = vmatprep.subr.bf16.mxu1 %v2683_v27 }
 0x4df   : > { %v1303_v7 = vpop.f32.mrb[12].mxu1 }
 0x4e0   : > { %v2492_v9 = vpop.f32.mrb[13].mxu1  ;;  %2314 = vmatmul.mubr.msk.f32.vlgmr.msra.gmra.mrb[6].mxu0 %vm1211_vm10, %v1303_v7 }
 0x4e1   : > { %v1306_v10 = vpop.f32.mrb[14].mxu1  ;;  %1477 = vmatprep.mubr.f32.mxu0 %v2680_v2 }
 0x4e2   : > { %v2493_v11 = vpop.f32.mrb[15].mxu1 }
 0x4e4   : > { %2315 = vmatmul.mubr.msk.f32.gmra.mrb[8].mxu0 %vm1211_vm10, %v1306_v10 }
 0x4e5   : > { %2503 = vmatprep.mubr.msk.bf16.mxu0 %vm2681_vm2, %v2680_v2 }
 0x4e7   : > { %v1386_v12 = vpop.f32.mrb[6].mxu1 }
 0x4e8   : > { %v1388_v13 = vpop.f32.mrb[7].mxu1 }
 0x4eb   : > { %v1392_v25 = vpop.f32.mrb[16].mxu1 }
 0x4ec   : > { %v1394_v26 = vpop.f32.mrb[17].mxu1 }
 0x5b3   : > { %v1473_v30 = vpop.f32.mrb[6].mxu0 }
 0x5b4   : > { %v1484_v31 = vmul.f32 %v1473_v30, %v1386_v12  ;;  %v1475_v22 = vpop.f32.mrb[7].mxu0 }
 0x5b5   : > { %v1485_v14 = vmul.f32 %v1475_v22, %v1388_v13  ;;  %v2325_v13 = vld [vmem:[%s3214_s19] ss:$0 sm:$0xff] }
 0x5b7   : > { %v1479_v15 = vpop.f32.mrb[8].mxu0  ;;  %1584 = vmatprep.mubr.f32.mxu1 %v1485_v14  ;;  %v2119_v14 = vld [vmem:[%s3217_s22] sm:$0xff] }
 0x5b8   : > { %v1486_v16 = vmul.f32 %v1479_v15, %v1392_v25  ;;  %v1481_v33 = vpop.f32.mrb[9].mxu0  ;;  %1585 = vmatmul.mubr.f32.vlgmr.msra.gmra.mrb[18].mxu1 %v1484_v31 }
 0x5b9   : > { %v1487_v34 = vmul.f32 %v1481_v33, %v1394_v26  ;;  %2631 = vmatpush3.bf16.msra.mxu1 %v2630_v32  ;;  %v2120_v32 = vld [vmem:[%s3217_s22 + $0x8] sm:$0xff]  ;;  %v2122_v33 = vld [vmem:[%s3217_s22 + $0x18] sm:$0xff] }
 0x5ba   : > { %2638 = vmatprep.subr.bf16.mxu1 %v2683_v27  ;;  %v2642_v15 = vpack.c.bf16 %v2120_v32, %v2119_v14 }
 0x5bb   : > { %1589 = vmatprep.mubr.f32.mxu1 %v1487_v34 }
 0x5bc   : > { %1590 = vmatmul.mubr.f32.gmra.mrb[20].mxu1 %v1486_v16  ;;  %v2121_v16 = vld [vmem:[%s3217_s22 + $0x10] sm:$0xff] }
 0x5bd   : > { %2498 = vmatprep.mubr.msk.f32.mxu1 %vm2681_vm2, %v2680_v2  ;;  %v2645_v34 = vpack.c.bf16 %v2122_v33, %v2121_v16 }
 0x5c0   : > { %2499 = vmatmul.mubr.msk.f32.vlgmr.msra.gmra.mrb[22].mxu1 %vm1211_vm10, %v2976_v24  ;;  %v1723_v24 = vld [vmem:[%s3210_s15] sm:$0xff] }
 0x5c1   : > { %2535 = vmatprep.mubr.msk.f32.mxu1 %vm2681_vm2, %v2680_v2 }
 0x68b   : > { %v2395_v35 = vpop.f32.mrb[18].mxu1 }
 0x68c   : > { %v2396_v36 = vpop.f32.mrb[19].mxu1 }
 0x68d   : > { %v2397_v37 = vadd.f32 %v2396_v36, %v2395_v35  ;;  %v2043_v35 = vld [vmem:[%s3216_s21] sm:$0x1] }
 0x68f   : > { %v2398_v38 = vpop.f32.mrb[20].mxu1 }
 0x690   : > { %v2399_v39 = vpop.f32.mrb[21].mxu1 }
 0x691   : > { %v2400_v40 = vadd.f32 %v2399_v39, %v2398_v38 }
 0x693   : > { %v1595_v41 = vpack.c.bf16 %v2400_v40, %v2397_v37  ;;  %v1667_v42 = vpop.f32.mrb[22].mxu1  ;;  %v2123_v40 = vld [vmem:[#allocation2] sm:$0x1] }
 0x694   : > { %v2500_v43 = vpop.f32.mrb[23].mxu1 }
 0x695   : > { %2502 = vmatpush3.bf16.msra.mxu0 %v1595_v41 }
 0x696   : > { %2507 = vmatprep.subr.mxu0 %v2680_v2 }
 0x698   : > { %2504 = vmatmul.mubr.msk.bf16.vlgmr.msra.gmra.mrb[12].mxu0 %vm1211_vm10, %v2947_v63  ;;  %v2633_v63 = vpack.c.bf16 %v1722_v45, %v1721_v44 }
 0x699   : > { %2509 = vmatprep.mubr.msk.f32.mxu0 %vm2681_vm2, %v2680_v2  ;;  %2508 = vmatpush3.msra.mxu0 %v1723_v24 }
 0x69a   : > { %2632 = vmatprep.subr.bf16.mxu0 %v2683_v27 }
 0x6a0   : > { %2510 = vmatmul.mubr.msk.f32.vlgmr.msra.gmra.mrb[10].mxu0 %vm824_vm9, %v2840_v8 }
 0x6a1   : > { %2516 = vmatprep.mubr.msk.f32.mxu0 %vm2681_vm2, %v2680_v2  ;;  %2634 = vmatpush3.bf16.msra.mxu0 %v2633_v63 }
 0x6a2   : > { %2519 = vmatprep.subr.mxu0 %v2680_v2 }
 0x76b   : > { %v1705_v46 = vpop.f32.mrb[12].mxu0 }
 0x76c   : > { %v1706_v48 = vadd.f32 %v1705_v46, %v1667_v42  ;;  %v2505_v49 = vpop.f32.mrb[13].mxu0 }
 0x76d   : > { %v1708_v50 = vpop.f32.mrb[14].mxu0 }
 0x76e   : > { %v1718_v51 = vadd.f32 %v2318_v47, %v1706_v48  ;;  %v2506_v52 = vpop.f32.mrb[15].mxu0 }
 0x770   : > { %v1719_v53 = vmul.f32 0.05, %v1718_v51 }
 0x772   : > { %v1720_v54 = vmax.f32 %v1718_v51, %v1719_v53 }
 0x773   : > { %v1790_v59 = vpop.f32.mrb[10].mxu0 }
 0x774   : > { %2517 = vmatmul.mubr.msk.f32.vlgmr.msra.gmra.mrb[16].mxu0 %vm1211_vm10, %v1720_v54  ;;  %v2511_v60 = vpop.f32.mrb[11].mxu0 }
 0x775   : > { %2520 = vmatpush3.msra.mxu0 %v1879_v55  ;;  %2521 = vmatprep.mubr.msk.f32.mxu0 %vm2681_vm2, %v2680_v2 }
 0x776   : > { %2635 = vmatprep.subr.bf16.mxu0 %v2683_v27 }
 0x778   : > { %2522 = vmatmul.mubr.msk.f32.vlgmr.msra.gmra.mrb[18].mxu0 %vm824_vm9, %v2840_v8  ;;  %v2042_v8 = vld [vmem:[%s3215_s20 + $0x8] sm:$0xff] }
 0x779   : > { %2637 = vmatpush3.bf16.msra.mxu0 %v2636_v58  ;;  %2528 = vmatprep.mubr.msk.f32.mxu0 %vm2681_vm2, %v2680_v2  ;;  %v2639_v62 = vpack.c.bf16 %v2042_v8, %v2041_v61 }
 0x77a   : > { %2641 = vmatprep.subr.bf16.mxu0 %v2683_v27 }
 0x77b   : > { %2640 = vmatpush3.bf16.msra.mxu1 %v2639_v62 }
 0x77c   : > { %2529 = vmatmul.mubr.msk.f32.vlgmr.msra.gmra.mrb[20].mxu0 %vm1211_vm10, %v1720_v54 }
 0x77d   : > { %2546 = vmatprep.mubr.msk.f32.mxu0 %vm2681_vm2, %v2680_v2  ;;  %2643 = vmatpush3.bf16.msra.mxu0 %v2642_v15 }
 0x77e   : > { %2644 = vmatprep.subr.bf16.mxu0 %v2683_v27 }
 0x781   : > { %2646 = vmatpush3.bf16.msra.mxu0 %v2645_v34 }
 0x847   : > { %v1863_v0 = vpop.f32.mrb[16].mxu0 }
 0x848   : > { %v1864_v3 = vadd.f32 %v1863_v0, %v1790_v59  ;;  %v2518_v4 = vpop.f32.mrb[17].mxu0 }
 0x84a   : > { %v1874_v2 = vadd.f32 %v2321_v1, %v1864_v3 }
 0x84b   : > { %v1946_v5 = vpop.f32.mrb[18].mxu0 }
 0x84c   : > { %v2322_v6 = vclamps-f32 %v1874_v2, 30.0  ;;  %v2523_v7 = vpop.f32.mrb[19].mxu0 }
 0x84e   : > { %v2028_v9 = vmul.f32 1.442695, %v2322_v6 }
 0x84f   : > { %v2016_v10 = vpop.f32.mrb[20].mxu0 }
 0x850   : > { %2661 = vpow2.f32 %v2028_v9  ;;  %v2017_v11 = vadd.f32 %v2016_v10, %v1946_v5  ;;  %v2530_v12 = vpop.f32.mrb[21].mxu0 }
 0x852   : > { %v2027_v17 = vadd.f32 %v2325_v13, %v2017_v11 }
 0x854   : > { %2663 = vtanh.f32 %v2027_v17 }
 0x85a   : > { %v2662_v18 = vpop.eup %2661 }
 0x85b   : > { %v2030_v19 = vadd.f32 1.0, %v2662_v18 }
 0x85d   : > { %2665 = vrcp.f32 %v2030_v19 }
 0x85e   : > { %v2664_v20 = vpop.eup %2663 }
 0x867   : > { %v2666_v21 = vpop.eup %2665 }
 0x868   : > { %v2033_v23 = vmul.f32 %v2666_v21, %v2664_v20 }
 0x86a   : > { %v2034_v25 = vsel %vm1211_vm10, %v2033_v23, 0.0 }
 0x86b   : > { %v2035_v26 = vrot.slane %v2034_v25, 4 }
 0x86d   : > { %v2036_v28 = vadd.f32 %v2035_v26, %v2034_v25 }
 0x86f   : > { %v2037_v29 = vrot.slane %v2036_v28, 2 }
 0x871   : > { %v2038_v30 = vadd.f32 %v2037_v29, %v2036_v28 }
 0x873   : > { %v2039_v31 = vrot.slane %v2038_v30, 1 }
 0x875   : > { %v2040_v22 = vadd.f32 %v2039_v31, %v2038_v30 }
 0x877   : > { %2536 = vmatmul.mubr.msk.f32.vlgmr.msra.gmra.mrb[24].mxu1 %vm1211_vm10, %v2040_v22 }
 0x94a   : > { %v2113_v36 = vpop.f32.mrb[24].mxu1 }
 0x94b   : > { %v2114_v37 = vadd.f32 %v2113_v36, %v2043_v35  ;;  %v2537_v38 = vpop.f32.mrb[25].mxu1 }
 0x94d   : > { %v2117_v39 = vmul.f32 0.05, %v2114_v37 }
 0x94f   : > { %v2118_v27 = vmax.f32 %v2114_v37, %v2117_v39 }
 0x951   : > { %2547 = vmatmul.mubr.msk.f32.vlgmr.msra.gmra.mrb[22].mxu0 %vm2124_vm11, %v2118_v27 }
 0xa24   : > { %v2194_v41 = vpop.f32.mrb[22].mxu0 }
 0xa25   : > { %v2195_v42 = vadd.f32 %v2194_v41, %v2123_v40  ;;  %v2548_v43 = vpop.f32.mrb[23].mxu0 }
 0xa27   : > { %v2198_v24 = vsub.f32 0.0, %v2195_v42 }
 0xa29   : > { %v2199_v44 = vmul.f32 0.25, %v2198_v24 }
 0xa2b   : > { %v2200_v45 = vmul.f32 1.442695, %v2199_v44 }
 0xa2d   : > { %2667 = vpow2.f32 %v2200_v45 }
 0xa37   : > { %v2668_v63 = vpop.eup %2667 }
 0xa38   : > { %v2202_v46 = vadd.f32 1.0, %v2668_v63 }
 0xa3a   : > { %2669 = vrcp.f32 %v2202_v46 }
 0xa44   : > { %v2670_v47 = vpop.eup %2669 }
 0xa45   : > { %2205 = vst.msk [vmem:[%s790_s26] sm:$0x1] %vm2204_vm12, %v2670_v47 }
 0xa46 PF: > { %s36_s27 = sadd.s32 1, %s2677_s27  }
 0xa47   : > { %p33_p5 = scmp.ge.s32.totalorder %s36_s27, 4  }
 0xa49   :  { %35 = sbr.rel (!%p33_p5) target bundleno = 10 (0xa), region = 155 }

</bundles_post_ra>
